<compile_context>
chip_gen: v7x
topology: tpu7x:2x2x1
jax: 0.10.0
libtpu: 0.0.40
codegen_flags: <defaults>
</compile_context>

<pallas_src>
import functools
import math

import jax
import jax.numpy as jnp
from jax.experimental import pallas as pl
from jax.experimental.pallas import tpu as pltpu


def _round_up(v, m):
    return (v + m - 1) // m * m


def _cdiv(a, b):
    return (a + b - 1) // b


def _vmem_capacity_bytes():
    """Physical VMEM of the local TPU generation (conservative fallback)."""
    try:
        cap = int(pltpu.get_tpu_info().vmem_capacity_bytes)
        if cap > 0:
            return cap
    except Exception:
        pass
    return 64 * 1024 * 1024   # v7x-safe fallback


# ---------------------------------------------------------------------------
# Pallas kernels: grouped GEMM over the modulated-deformable im2col columns.
# ---------------------------------------------------------------------------
def _mdcn_gemm_kernel(col_ref, w_ref, b_ref, o_ref):
    # col: (Kd, P_tile), w: (Cg_pad, Kd), b: (Cg_pad, 1), o: (Cg_pad, P_tile)
    acc = jnp.dot(w_ref[...], col_ref[...], preferred_element_type=jnp.float32)
    o_ref[...] = (acc + b_ref[...]).astype(o_ref.dtype)


def _mdcn_gemm_kernel_ktiled(col_ref, w_ref, b_ref, o_ref, acc_ref):
    # Same GEMM but with the contraction dim tiled on the innermost grid axis.
    k = pl.program_id(3)

    @pl.when(k == 0)
    def _():
        acc_ref[...] = jnp.zeros_like(acc_ref)

    acc_ref[...] += jnp.dot(w_ref[...], col_ref[...],
                            preferred_element_type=jnp.float32)

    @pl.when(k == pl.num_programs(3) - 1)
    def _():
        o_ref[...] = (acc_ref[...] + b_ref[...]).astype(o_ref.dtype)


# ---------------------------------------------------------------------------
# Modulated deformable im2col (mmcv CUDA semantics), plain XLA.
# Returns cols in the final grouped GEMM layout:
#   (N, groups, cin_g*kh*kw, Hout*Wout), compute_dtype (single cast, fuses).
# ---------------------------------------------------------------------------
def _deform_im2col(x, offset, mask, kh, kw, stride, padding, dilation,
                   deform_groups, groups, Hout, Wout, compute_dtype):
    N, cin, H, W = x.shape
    sh, sw = stride
    pdh, pdw = padding
    dh, dw = dilation
    K = kh * kw
    P = Hout * Wout
    cpd = cin // deform_groups

    off = offset.reshape(N, deform_groups, K, 2, Hout, Wout).astype(jnp.float32)
    msk = mask.reshape(N, deform_groups, K, Hout, Wout).astype(jnp.float32)

    ki = (jnp.arange(K) // kw).astype(jnp.float32) * dh                 # (K,)
    kj = (jnp.arange(K) % kw).astype(jnp.float32) * dw
    base_h = jnp.arange(Hout, dtype=jnp.float32) * sh - pdh             # (Hout,)
    base_w = jnp.arange(Wout, dtype=jnp.float32) * sw - pdw             # (Wout,)

    ph = (off[:, :, :, 0]
          + base_h[None, None, None, :, None]
          + ki[None, None, :, None, None])                              # (N,DG,K,Ho,Wo)
    pw = (off[:, :, :, 1]
          + base_w[None, None, None, None, :]
          + kj[None, None, :, None, None])

    valid = (ph > -1.0) & (ph < float(H)) & (pw > -1.0) & (pw < float(W))
    h0f = jnp.floor(ph)
    w0f = jnp.floor(pw)
    lh = ph - h0f
    lw = pw - w0f
    hh = 1.0 - lh
    hw_ = 1.0 - lw
    h0 = h0f.astype(jnp.int32)
    w0 = w0f.astype(jnp.int32)
    h1 = h0 + 1
    w1 = w0 + 1

    def corner_weight(in_bounds, wgt):
        # Zero OOB corners explicitly and fold the modulation mask into the
        # bilinear weight (blend stays in f32; one cast to bf16 at the end).
        return jnp.where(valid & in_bounds, wgt, 0.0) * msk

    w00 = corner_weight((h0 >= 0) & (w0 >= 0), hh * hw_)
    w01 = corner_weight((h0 >= 0) & (w1 <= W - 1), hh * lw)
    w10 = corner_weight((h1 <= H - 1) & (w0 >= 0), lh * hw_)
    w11 = corner_weight((h1 <= H - 1) & (w1 <= W - 1), lh * lw)

    h0c = jnp.clip(h0, 0, H - 1)
    h1c = jnp.clip(h1, 0, H - 1)
    w0c = jnp.clip(w0, 0, W - 1)
    w1c = jnp.clip(w1, 0, W - 1)

    xg = x.reshape(N, deform_groups, cpd, H * W).astype(jnp.float32)
    KP = K * P

    def gathered(hi, wi, wgt):
        idx = (hi * W + wi).reshape(N, deform_groups, 1, KP)
        idx = jnp.broadcast_to(idx, (N, deform_groups, cpd, KP))
        v = jnp.take_along_axis(xg, idx, axis=-1)                       # (N,DG,cpd,KP)
        return v * wgt.reshape(N, deform_groups, 1, KP)

    val = (gathered(h0c, w0c, w00) + gathered(h0c, w1c, w01)
           + gathered(h1c, w0c, w10) + gathered(h1c, w1c, w11))

    # (N, DG, cpd, K*P) -> (N, cin, K, P) -> (N, groups, cin_g*K, P); single cast.
    cols = val.reshape(N, cin, K, P).reshape(N, groups, (cin // groups) * K, P)
    return cols.astype(compute_dtype)


# ---------------------------------------------------------------------------
# Generation-aware tile selection.
# ---------------------------------------------------------------------------
def _select_tiles(Kd, Cg_pad, P, esz, vmem_cap):
    if vmem_cap >= 100 * (1 << 20):                 # v5e / v6e (128 MiB VMEM)
        budget = 96 * (1 << 20)
    else:                                           # v7x (64 MiB VMEM)
        budget = max(24 * (1 << 20), vmem_cap - 24 * (1 << 20))

    def cost(p_tile, k_blk, with_acc):
        b = 2 * (k_blk * p_tile + Cg_pad * k_blk) * esz    # cols + W, double-buffered
        b += 2 * Cg_pad * 4                                # bias (f32)
        b += 2 * Cg_pad * p_tile * esz                     # output, double-buffered
        if with_acc:
            b += Cg_pad * p_tile * 4                       # f32 accumulator scratch
        return b

    p_full = _round_up(P, 128)
    p_cands = [p for p in (2048, 1024, 512, 256, 128) if p <= p_full] or [128]

    for p_tile in p_cands:
        # Prefer a full-depth K block: no pad pass over cols, no K grid axis.
        if cost(p_tile, Kd, False) <= budget:
            return p_tile, 1, Kd, budget
        # Deep-K configs (e.g. large cin_g on v7x): keep P_tile large, tile K.
        nk = 2
        while True:
            k_blk = _round_up(_cdiv(Kd, nk), 128)   # 128-aligned for the W block
            if cost(p_tile, k_blk, True) <= budget:
                return p_tile, nk, k_blk, budget
            if k_blk <= 128:
                break
            nk *= 2
    # Last resort (practically unreachable).
    return 128, max(1, _cdiv(Kd, 128)), min(Kd, 128) if Kd <= 128 else 128, budget


# ---------------------------------------------------------------------------
# Forward
# ---------------------------------------------------------------------------
@functools.partial(jax.jit, static_argnames=(
    "stride", "padding", "dilation", "groups", "deform_groups",
    "compute_dtype", "vmem_cap"))
def _mdcn_forward(x, offset, mask, weight, bias, *, stride, padding, dilation,
                  groups, deform_groups, compute_dtype, vmem_cap):
    N, cin, H, W = x.shape
    cout, cin_g, kh, kw = weight.shape
    sh, sw = stride
    pdh, pdw = padding
    dh, dw = dilation
    Hout = (H + 2 * pdh - (dh * (kh - 1) + 1)) // sh + 1
    Wout = (W + 2 * pdw - (dw * (kw - 1) + 1)) // sw + 1
    K = kh * kw
    P = Hout * Wout
    cout_g = cout // groups
    Kd = cin_g * K
    Cg_pad = _round_up(cout_g, 8)
    esz = jnp.dtype(compute_dtype).itemsize

    # --- deformable modulated im2col (XLA), already grouped & in compute_dtype.
    cols = _deform_im2col(x, offset, mask, kh, kw, stride, padding, dilation,
                          deform_groups, groups, Hout, Wout, compute_dtype)

    P_tile, nk, K_blk, budget = _select_tiles(Kd, Cg_pad, P, esz, vmem_cap)
    P_pad = _round_up(P, P_tile)
    Kd_pad = nk * K_blk if nk > 1 else Kd

    if P_pad != P or Kd_pad != Kd:
        # Only hit when P is not lane-aligned to the chosen tile, or when the
        # (rare) K-tiled path needs a 128-aligned contraction dim.
        cols = jnp.pad(cols, ((0, 0), (0, 0), (0, Kd_pad - Kd), (0, P_pad - P)))

    w_g = weight.reshape(groups, cout_g, Kd).astype(compute_dtype)
    w_g = jnp.pad(w_g, ((0, 0), (0, Cg_pad - cout_g), (0, Kd_pad - Kd)))
    b_g = bias.reshape(groups, cout_g, 1).astype(jnp.float32)
    b_g = jnp.pad(b_g, ((0, 0), (0, Cg_pad - cout_g), (0, 0)))

    out_shape = jax.ShapeDtypeStruct((N, groups, Cg_pad, P_pad), compute_dtype)

    if nk == 1:
        grid_spec = pltpu.PrefetchScalarGridSpec(
            num_scalar_prefetch=0,
            grid=(groups, N, P_pad // P_tile),
            in_specs=[
                pl.BlockSpec((None, None, Kd, P_tile),
                             lambda g, n, p: (n, g, 0, p)),
                pl.BlockSpec((None, Cg_pad, Kd),
                             lambda g, n, p: (g, 0, 0)),
                pl.BlockSpec((None, Cg_pad, 1),
                             lambda g, n, p: (g, 0, 0)),
            ],
            out_specs=pl.BlockSpec((None, None, Cg_pad, P_tile),
                                   lambda g, n, p: (n, g, 0, p)),
        )
        kernel = _mdcn_gemm_kernel
        dims = ("parallel", "parallel", "parallel")
    else:
        grid_spec = pltpu.PrefetchScalarGridSpec(
            num_scalar_prefetch=0,
            grid=(groups, N, P_pad // P_tile, nk),
            in_specs=[
                pl.BlockSpec((None, None, K_blk, P_tile),
                             lambda g, n, p, k: (n, g, k, p)),
                pl.BlockSpec((None, Cg_pad, K_blk),
                             lambda g, n, p, k: (g, 0, k)),
                pl.BlockSpec((None, Cg_pad, 1),
                             lambda g, n, p, k: (g, 0, 0)),
            ],
            out_specs=pl.BlockSpec((None, None, Cg_pad, P_tile),
                                   lambda g, n, p, k: (n, g, 0, p)),
            scratch_shapes=[pltpu.VMEM((Cg_pad, P_tile), jnp.float32)],
        )
        kernel = _mdcn_gemm_kernel_ktiled
        dims = ("parallel", "parallel", "parallel", "arbitrary")

    out = pl.pallas_call(
        kernel,
        out_shape=out_shape,
        grid_spec=grid_spec,
        compiler_params=pltpu.CompilerParams(
            dimension_semantics=dims,
            vmem_limit_bytes=int(budget)),
    )(cols, w_g, b_g)

    # Cheap epilogue: drop padding, restore NCHW, cast back to the input dtype.
    out = out[:, :, :cout_g, :P].reshape(N, cout, Hout, Wout).astype(x.dtype)
    return out


def modulated_deform_conv2d(x, offset, mask, weight, bias=None,
                            stride=(1, 1), padding=(0, 0), dilation=(1, 1),
                            groups=1, deform_groups=1,
                            compute_dtype=jnp.bfloat16):
    pair = lambda v: (v, v) if isinstance(v, int) else tuple(v)
    if bias is None:
        bias = jnp.zeros((weight.shape[0],), jnp.float32)
    return _mdcn_forward(x, offset, mask, weight, bias,
                         stride=pair(stride), padding=pair(padding),
                         dilation=pair(dilation), groups=int(groups),
                         deform_groups=int(deform_groups),
                         compute_dtype=compute_dtype,
                         vmem_cap=_vmem_capacity_bytes())


class ModulatedDeformConv2d:
    """JAX/Pallas equivalent of mmcv ModulatedDeformConv2d (forward only)."""

    def __init__(self, in_channels, out_channels, kernel_size, stride=1,
                 padding=0, dilation=1, groups=1, deform_groups=1, bias=True,
                 key=None, compute_dtype=jnp.bfloat16):
        pair = lambda v: (v, v) if isinstance(v, int) else tuple(v)
        self.in_channels = in_channels
        self.out_channels = out_channels
        self.kernel_size = pair(kernel_size)
        self.stride = pair(stride)
        self.padding = pair(padding)
        self.dilation = pair(dilation)
        self.groups = groups
        self.deform_groups = deform_groups
        self.compute_dtype = compute_dtype
        if key is None:
            key = jax.random.PRNGKey(0)
        kh, kw = self.kernel_size
        n = in_channels * kh * kw
        stdv = 1.0 / math.sqrt(n)
        self.weight = jax.random.uniform(
            key, (out_channels, in_channels // groups, kh, kw),
            jnp.float32, minval=-stdv, maxval=stdv)
        self.bias = jnp.zeros((out_channels,), jnp.float32) if bias else None

    def __call__(self, x, offset, mask):
        return modulated_deform_conv2d(
            x, offset, mask, self.weight, self.bias,
            self.stride, self.padding, self.dilation,
            self.groups, self.deform_groups, self.compute_dtype)


# ---------------------------------------------------------------------------
# Pure-JAX reference (mirrors the mmcv CUDA forward semantics)
# ---------------------------------------------------------------------------
def _reference_forward(x, offset, mask, weight, bias,
                       stride, padding, dilation, groups, deform_groups):
    N, cin, H, W = x.shape
    cout, cin_g, kh, kw = weight.shape
    sh, sw = stride
    pdh, pdw = padding
    dh, dw = dilation
    Hout = (H + 2 * pdh - (dh * (kh - 1) + 1)) // sh + 1
    Wout = (W + 2 * pdw - (dw * (kw - 1) + 1)) // sw + 1
    cin_per_dg = cin // deform_groups
    cout_g = cout // groups

    ho = jnp.arange(Hout)[:, None]
    wo = jnp.arange(Wout)[None, :]

    outs = []
    for n in range(N):
        acc = jnp.zeros((cout, Hout, Wout), jnp.float32)
        for i in range(kh):
            for j in range(kw):
                k = i * kw + j
                sampled = []
                for dg in range(deform_groups):
                    off_h = offset[n, dg * 2 * kh * kw + 2 * k]
                    off_w = offset[n, dg * 2 * kh * kw + 2 * k + 1]
                    m = mask[n, dg * kh * kw + k]
                    ph = ho * sh - pdh + i * dh + off_h
                    pw = wo * sw - pdw + j * dw + off_w
                    valid = (ph > -1) & (ph < H) & (pw > -1) & (pw < W)
                    h0f = jnp.floor(ph)
                    w0f = jnp.floor(pw)
                    lh = ph - h0f
                    lw = pw - w0f
                    hh = 1 - lh
                    hw_ = 1 - lw
                    h0 = h0f.astype(jnp.int32)
                    w0 = w0f.astype(jnp.int32)
                    h1 = h0 + 1
                    w1 = w0 + 1
                    xg = x[n, dg * cin_per_dg:(dg + 1) * cin_per_dg]
                    xg = xg.reshape(cin_per_dg, H * W)

                    def corner(hi, wi, cw, cond):
                        flat = jnp.clip(hi, 0, H - 1) * W + jnp.clip(wi, 0, W - 1)
                        v = xg[:, flat]
                        return v * jnp.where(cond & valid, cw, 0.0)[None]

                    val = (corner(h0, w0, hh * hw_, (h0 >= 0) & (w0 >= 0))
                           + corner(h0, w1, hh * lw, (h0 >= 0) & (w1 <= W - 1))
                           + corner(h1, w0, lh * hw_, (h1 <= H - 1) & (w0 >= 0))
                           + corner(h1, w1, lh * lw, (h1 <= H - 1) & (w1 <= W - 1)))
                    sampled.append(val * m[None])
                sampled = jnp.concatenate(sampled, axis=0)  # (cin, Hout, Wout)
                for g in range(groups):
                    wg = weight[g * cout_g:(g + 1) * cout_g, :, i, j]
                    sg = sampled[g * cin_g:(g + 1) * cin_g]
                    acc = acc.at[g * cout_g:(g + 1) * cout_g].add(
                        jnp.einsum('oc,chw->ohw', wg, sg))
        if bias is not None:
            acc = acc + bias[:, None, None]
        outs.append(acc)
    return jnp.stack(outs)


if __name__ == "__main__":
    key = jax.random.PRNGKey(0)
    N, Cin, H, W = 2, 4, 16, 16
    Cout, ksz = 8, 3
    stride, padding, dilation = 1, 1, 1
    groups, deform_groups = 2, 2
    Hout = (H + 2 * padding - (dilation * (ksz - 1) + 1)) // stride + 1
    Wout = (W + 2 * padding - (dilation * (ksz - 1) + 1)) // stride + 1

    kx, ko, km, kw_ = jax.random.split(key, 4)
    x = jax.random.normal(kx, (N, Cin, H, W), jnp.float32)
    offset = 0.7 * jax.random.normal(
        ko, (N, deform_groups * 2 * ksz * ksz, Hout, Wout), jnp.float32)
    mask = jax.nn.sigmoid(
        jax.random.normal(km, (N, deform_groups * ksz * ksz, Hout, Wout),
                          jnp.float32))

    conv = ModulatedDeformConv2d(Cin, Cout, ksz, stride=stride, padding=padding,
                                 dilation=dilation, groups=groups,
                                 deform_groups=deform_groups, bias=True, key=kw_)

    ref = _reference_forward(x, offset, mask, conv.weight, conv.bias,
                             conv.stride, conv.padding, conv.dilation,
                             groups, deform_groups)

    # Tight check with f32 MXU operands (validates kernel plumbing; default MXU
    # precision, hence the 1e-3 tolerance rather than exact f32).
    out_f32 = modulated_deform_conv2d(
        x, offset, mask, conv.weight, conv.bias,
        conv.stride, conv.padding, conv.dilation, groups, deform_groups,
        compute_dtype=jnp.float32)
    out_f32 = jax.block_until_ready(out_f32)
    assert out_f32.shape == (N, Cout, Hout, Wout)
    err_f32 = float(jnp.max(jnp.abs(out_f32 - ref)))
    assert err_f32 < 1e-3, f"f32 max abs error {err_f32}"

    # Default fast path: bf16 cols/weights/output, f32 accumulation on the MXU.
    out = conv(x, offset, mask)
    out = jax.block_until_ready(out)
    assert out.shape == (N, Cout, Hout, Wout)
    err_bf16 = float(jnp.max(jnp.abs(out - ref)))
    assert err_bf16 < 5e-2, f"bf16 max abs error {err_bf16}"

    print("KERNEL_OK")
</pallas_src>

<mosaic_0001>
module attributes {stable_mosaic.version = 11 : i64} {
  func.func @_mdcn_gemm_kernel(%arg0: i32, %arg1: i32, %arg2: i32, %arg3: memref<1x1x18x256xf32, #tpu.memory_space<vmem>>, %arg4: memref<1x8x18xf32, #tpu.memory_space<vmem>>, %arg5: memref<1x8x1xf32, #tpu.memory_space<vmem>>, %arg6: memref<1x1x8x256xf32, #tpu.memory_space<vmem>>) attributes {dimension_semantics = [#tpu.dimension_semantics<parallel>, #tpu.dimension_semantics<parallel>, #tpu.dimension_semantics<parallel>], iteration_bounds = array<i64: 2, 2, 1>, scalar_prefetch = 0 : i64, scratch_operands = 0 : i64, tpu.core_type = #tpu.core_type<tc>, window_params = [{transform_indices = @transform_0, window_bounds = array<i64: 1, 1, 18, 256>}, {transform_indices = @transform_1, window_bounds = array<i64: 1, 8, 18>}, {transform_indices = @transform_2, window_bounds = array<i64: 1, 8, 1>}, {transform_indices = @transform_3, window_bounds = array<i64: 1, 1, 8, 256>}]} {
    %c0 = arith.constant 0 : index
    %c0_0 = arith.constant 0 : index
    %c0_1 = arith.constant 0 : index
    %0 = vector.load %arg4[%c0, %c0_0, %c0_1] : memref<1x8x18xf32, #tpu.memory_space<vmem>>, vector<1x8x18xf32>
    %1 = vector.shape_cast %0 : vector<1x8x18xf32> to vector<8x18xf32>
    %c0_2 = arith.constant 0 : index
    %c0_3 = arith.constant 0 : index
    %c0_4 = arith.constant 0 : index
    %c0_5 = arith.constant 0 : index
    %2 = vector.load %arg3[%c0_2, %c0_3, %c0_4, %c0_5] : memref<1x1x18x256xf32, #tpu.memory_space<vmem>>, vector<1x1x18x256xf32>
    %3 = vector.shape_cast %2 : vector<1x1x18x256xf32> to vector<18x256xf32>
    %cst = arith.constant dense<0.000000e+00> : vector<8x256xf32>
    %4 = tpu.matmul %1, %3, %cst {dimension_numbers = #tpu.dot_dimension_numbers<[1], [0], [0], [1], [0, 0, 1, 1], [], []>} : vector<8x18xf32>, vector<18x256xf32>, vector<8x256xf32> -> vector<8x256xf32>
    %c0_6 = arith.constant 0 : index
    %c0_7 = arith.constant 0 : index
    %c0_8 = arith.constant 0 : index
    %5 = vector.load %arg5[%c0_6, %c0_7, %c0_8] : memref<1x8x1xf32, #tpu.memory_space<vmem>>, vector<1x8x1xf32>
    %6 = vector.shape_cast %5 : vector<1x8x1xf32> to vector<8x1xf32>
    %7 = vector.broadcast %6 : vector<8x1xf32> to vector<8x256xf32>
    %8 = arith.addf %4, %7 : vector<8x256xf32>
    %c0_9 = arith.constant 0 : index
    %c0_10 = arith.constant 0 : index
    %c0_11 = arith.constant 0 : index
    %c0_12 = arith.constant 0 : index
    %9 = vector.load %arg6[%c0_9, %c0_10, %c0_11, %c0_12] : memref<1x1x8x256xf32, #tpu.memory_space<vmem>>, vector<1x1x8x256xf32>
    %10 = vector.shape_cast %9 : vector<1x1x8x256xf32> to vector<8x256xf32>
    %11 = vector.shape_cast %8 : vector<8x256xf32> to vector<1x1x8x256xf32>
    tpu.vector_store %arg6[%c0_9, %c0_10, %c0_11, %c0_12], %11 {strides = array<i32>} : memref<1x1x8x256xf32, #tpu.memory_space<vmem>>, vector<1x1x8x256xf32>,
    return
  }
  func.func @transform_0(%arg0: i32, %arg1: i32, %arg2: i32) -> (i32, i32, i32, i32) {
    %c0_i32 = arith.constant 0 : i32
    %c0_i32_0 = arith.constant 0 : i32
    return %arg1, %arg0, %c0_i32, %arg2 : i32, i32, i32, i32
  }
  func.func @transform_1(%arg0: i32, %arg1: i32, %arg2: i32) -> (i32, i32, i32) {
    %c0_i32 = arith.constant 0 : i32
    %c0_i32_0 = arith.constant 0 : i32
    %c0_i32_1 = arith.constant 0 : i32
    return %arg0, %c0_i32, %c0_i32_0 : i32, i32, i32
  }
  func.func @transform_2(%arg0: i32, %arg1: i32, %arg2: i32) -> (i32, i32, i32) {
    %c0_i32 = arith.constant 0 : i32
    %c0_i32_0 = arith.constant 0 : i32
    %c0_i32_1 = arith.constant 0 : i32
    return %arg0, %c0_i32, %c0_i32_0 : i32, i32, i32
  }
  func.func @transform_3(%arg0: i32, %arg1: i32, %arg2: i32) -> (i32, i32, i32, i32) {
    %c0_i32 = arith.constant 0 : i32
    %c0_i32_0 = arith.constant 0 : i32
    return %arg1, %arg0, %c0_i32, %arg2 : i32, i32, i32, i32
  }
}

</mosaic_0001>

<bundles_post_ra>
// kernel: _mdcn_forward.1
= control target key start
LH: loop header
LB: loop body
LE: loop exit
PB: predicated region body
PF: predicated region fallthrough
CT: control target
= control target key end

     0   :  { %s638_s12 = smov 0   ;;  %s640_s13 = smov 0   ;;  %s695_s0 = inlined_call_operand.vmem [shape: f32[2,2,18,256], index: 0, kind: input, shape index: {}]   ;;  %s696_s1 = inlined_call_operand.vmem [shape: f32[2,8,18], index: 1, kind: input, shape index: {}]   ;;  %s697_s2 = inlined_call_operand.vmem [shape: f32[2,8,1], index: 2, kind: input, shape index: {}]   ;;  %s698_s3 = inlined_call_operand.vmem [shape: f32[2,2,8,256], index: 3, kind: output, shape index: {}]  }
   0x1   :  { %s642_s14 = smov 0   ;;  %s644_s15 = smov 0  }
   0x2   :  { %s646_s16 = smov 0  }
   0x3 LB: > { %s28_s17 = sadd.s32 1, %s606_s14  ;;  %s32_s18 = sadd.s32 1, %s610_s15  ;;  %s614_s16 = sphi %s646_s16, %s13_s16   ;;  %s610_s15 = sphi %s644_s15, %s702_s15   ;;  %s606_s14 = sphi %s642_s14, %s701_s14   ;;  %s602_s13 = sphi %s640_s13, %s700_s13   ;;  %s598_s12 = sphi %s638_s12, %s699_s12  }
   0x4   : > { %p30_p0 = scmp.ge.s32.totalorder %s28_s17, 2  ;;  %p515_p1 = scmp.ge.s32.totalorder %s614_s16, 1 }
   0x5   : > { %p191_p2 = scmp.lt.s32.totalorder %s614_s16, 5 }
   0x6   : > { %s704_s17 = smov (%p30_p0, %s28_s17), 0  ;;  %s706_s18 = smov (!%p30_p0, %s32_s18), %s610_s15 }
   0x7   : > { %p192_p3 = pnand %p515_p1, %p191_p2  ;;  %p34_p4 = scmp.ge.s32.totalorder %s706_s18, 2 }
   0x8   : > { %p240_p5 = scmp.lt.s32.totalorder (!%p192_p3), %s598_s12, 1  ;;  %p242_p6 = scmp.lt.s32.totalorder (!%p192_p3), %s602_s13, 1  ;;  %v616_v0 = vmov (!%p192_p3), 0.0   ;;  %v617_v1 = vmov (!%p192_p3), 0   ;;  %vm292_vm0 = vcmask (!%p192_p3), 1041408   ;;  %vm288_vm1 = vcmask (!%p192_p3), 146432  }
   0x9   : > { %s708_s18 = smov (%p34_p4, %s706_s18), 0  ;;  %195 = sbr.rel (%p192_p3) target bundleno = 248 (0xf8), region = 32 }
   0xa   : > { %363 = vmatprep.mubr.f32.mxu0 (!%p192_p3), %v616_v0  ;;  %575 = vset.pattern.permute.xlu0 (!%p192_p3), %v617_v1 }
  0x10   : > { %s710_s12 = smov (!%p240_p5, %s598_s12), 1  ;;  %s712_s13 = smov (!%p242_p6, %s602_s13), 1 }
  0x11   : > { %s532_s19 = smul.u32 12, %s710_s12  ;;  %s517_s21 = sshll.u32 %s712_s13, 3 }
  0x12   : > { %s531_s20 = smul.u32 6, %s712_s13  ;;  %s260_s24 = scalar_lea.vmem %s697_s2, %s517_s21 }
  0x13   : > { %v282_v2 = vld [vmem:[%s260_s24] sm:$0xff]  ;;  %s519_s26 = sshll.u32 %s712_s13, 1  ;;  %s520_s28 = sshll.u32 %s710_s12, 2 }
  0x14   : > { %s249_s25 = sadd.s32 %s532_s19, %s531_s20  ;;  %285 = vperm.xlu0 %575, %v282_v2   ;;  %s271_s5 = sadd.s32 %s520_s28, %s519_s26 }
  0x15   : > { %s516_s27 = sshll.u32 %s249_s25, 3  ;;  %s256_s8 = scalar_lea.vmem %s696_s1, %s517_s21 }
  0x16   : > { %s251_s4 = scalar_lea.vmem %s695_s0, %s516_s27  ;;  %v275_v11 = vld [vmem:[%s256_s8] sm:$0xff]  ;;  %s521_s9 = sshll.u32 %s271_s5, 3 }
  0x17   : > { %v277_v3 = vld [vmem:[%s251_s4 + $0x8] sm:$0xff]  ;;  %v279_v4 = vld [vmem:[%s251_s4 + $0x18] sm:$0xff]  ;;  %v276_v5 = vld [vmem:[%s251_s4] sm:$0xff]  ;;  %s273_s12 = scalar_lea.vmem %s698_s3, %s521_s9 }
  0x18   : > { %v527_v6 = vpack.c.bf16 %v279_v4, %v277_v3  ;;  %v278_v7 = vld [vmem:[%s251_s4 + $0x10] sm:$0xff]  ;;  %v281_v9 = vld [vmem:[%s251_s4 + $0x28] sm:$0x3]  ;;  %v280_v10 = vld [vmem:[%s251_s4 + $0x20] sm:$0x3] }
  0x19   : > { %v529_v8 = vpack.c.bf16 %v278_v7, %v276_v5 }
  0x1a   : > { %528 = vmatprep.subr.bf16.mxu0 %v527_v6 }
  0x1b   : > { %530 = vmatpush1.bf16.msra.mxu0 %v529_v8 }
  0x1c   : > { %522 = vmatprep.subr.msk.mxu0 %vm292_vm0, %v281_v9 }
  0x1f   : > { %523 = vmatpush1.msk.msra.mxu0 %vm292_vm0, %v280_v10 }
  0x20   : > { %524 = vmatmul.mubr.msk.f32.vlgmr.msra.gmra.mrb[0].mxu0 %vm288_vm1, %v275_v11 }
  0x93   : > { %v286_v12 = vpop.permute.xlu0 %285 }
  0xf3   : > { %v365_v13 = vpop.f32.mrb[0].mxu0 }
  0xf4   : > { %v366_v14 = vadd.f32 %v365_v13, %v286_v12  ;;  %v367_v15 = vpop.f32.mrb[1].mxu0 }
  0xf5   : > { %v368_v16 = vadd.f32 %v367_v15, %v286_v12 }
  0xf6   : > { %370 = vst [vmem:[%s273_s12] sm:$0xff] %v366_v14 }
  0xf7   : > { %371 = vst [vmem:[%s273_s12 + $0x8] sm:$0xff] %v368_v16 }
  0xf8 PF: > { %s13_s16 = sadd.s32 1, %s614_s16   ;;  %s699_s12 = smov %s606_s14 }
  0xf9   : > { %p10_p7 = scmp.ge.s32.totalorder %s13_s16, 6   ;;  %s700_s13 = smov %s610_s15 }
  0xfa   : > { %s701_s14 = smov %s704_s17  ;;  %s702_s15 = smov %s708_s18 }
  0xfb   :  { %12 = sbr.rel (!%p10_p7) target bundleno = 3 (0x3), region = 68 }

</bundles_post_ra>
